<compile_context>
chip_gen: v7x
topology: tpu7x:2x2x1
jax: 0.10.0
libtpu: 0.0.40
codegen_flags: <defaults>
</compile_context>

<pallas_src>
import jax
import jax.numpy as jnp
from jax.experimental import pallas as pl
from jax.experimental.pallas import tpu as pltpu

GATE_BLK = 128          # per-gate, 128-aligned column block
GATE_W = 4 * GATE_BLK   # 512 columns: [i | f | g | o], each zero-padded to 128
C_BLK = 128             # padded width of the c lane block / c_t -> h projection


def _round_up(x, m):
    return (x + m - 1) // m * m


def _gru_cell_kernel(x_ref, c_ref, wg_ref, wch_ref, out_ref):
    # One fused MXU pass: gates = [inp_flat | h | 1 | 0pad] @ W_big  (mean + concat +
    # all gate biases already folded into W_big).  (B, 512)
    gates = jnp.dot(x_ref[...], wg_ref[...], preferred_element_type=jnp.float32)

    # Whole-vreg, 128-aligned gate slices (pad lanes: weights/bias are zero).
    i_t = jax.nn.sigmoid(gates[:, 0:GATE_BLK])              # pad lanes -> 0.5
    f_t = jax.nn.sigmoid(gates[:, GATE_BLK:2 * GATE_BLK])   # pad lanes -> 0.5
    g_t = jnp.tanh(gates[:, 2 * GATE_BLK:3 * GATE_BLK])     # pad lanes -> 0.0
    o_t = jax.nn.sigmoid(gates[:, 3 * GATE_BLK:4 * GATE_BLK])

    # c_ref lanes: [c (C) | 2.0 | 0...]; after gating c_t = [c_t (C) | 1.0 | 0...].
    # The 1.0 "bias lane" multiplies the b_ch row of wch_ref, folding that bias too.
    c_t = f_t * c_ref[...] + i_t * g_t                       # (B, 128)

    ch = jnp.dot(c_t, wch_ref[...], preferred_element_type=jnp.float32)  # (B, 128)
    h_t = o_t * jnp.tanh(ch)                                 # pad lanes: 0.5 * tanh(0) = 0

    # Two unmasked full-vreg stores into the lane-dense output slab.
    out_ref[:, 0:C_BLK] = h_t
    out_ref[:, C_BLK:2 * C_BLK] = c_t


def pack_params(params, n_points, h_size, c_size):
    """Pack the 9 nn.Linear (weight, bias) pairs into two MXU-ready matrices.

    params[name] = (W, b) in PyTorch layout: W is (out, in), b is (out,).
    Returns:
      w_big : (K_pad, 512) rows = [ N copies of Wx/N ; Wh ; gate-bias row ; zero pad ],
              cols = 128-aligned blocks [i | f | g | o] (bx + bh pre-summed in bias row).
      w_ch  : (128, 128)   rows = [ Wch^T (C) ; b_ch row ; zeros ], cols padded to 128.
    """
    N, H, C = n_points, h_size, c_size
    assert H <= GATE_BLK and C <= GATE_BLK and C + 1 <= C_BLK

    def wT(name):
        return params[name][0].T          # (in, out)

    def b(name):
        return params[name][1]            # (out,)

    def gate_block(xname, hname, width):
        wx = jnp.pad(wT(xname), ((0, 0), (0, GATE_BLK - width)))            # (H, 128)
        wh = jnp.pad(wT(hname), ((0, 0), (0, GATE_BLK - width)))            # (H, 128)
        bias = jnp.pad(b(xname) + b(hname), (0, GATE_BLK - width))          # (128,)
        return wx, wh, bias

    blocks = [gate_block("i_t_x", "i_t_h", C),
              gate_block("f_t_x", "f_t_h", C),
              gate_block("g_t_x", "g_t_h", C),
              gate_block("o_t_x", "o_t_h", H)]
    wx_all = jnp.concatenate([blk[0] for blk in blocks], axis=1)            # (H, 512)
    wh_all = jnp.concatenate([blk[1] for blk in blocks], axis=1)            # (H, 512)
    b_all = jnp.concatenate([blk[2] for blk in blocks], axis=0)             # (512,)

    k = N * H + H + 1
    k_pad = _round_up(k, 128)
    w_big = jnp.concatenate(
        [jnp.tile(wx_all / N, (N, 1)),                 # mean over N folded into weights
         wh_all,                                       # h path
         b_all[None, :],                               # bias row (matches the 1.0 column)
         jnp.zeros((k_pad - k, GATE_W), jnp.float32)], axis=0)               # (k_pad, 512)

    w_ch = jnp.concatenate(
        [jnp.pad(wT("c_t_h"), ((0, 0), (0, C_BLK - H))),                     # (C, 128)
         jnp.pad(b("c_t_h"), (0, C_BLK - H))[None, :],                       # bias row at index C
         jnp.zeros((C_BLK - C - 1, C_BLK), jnp.float32)], axis=0)            # (128, 128)

    return w_big, w_ch


def gru_forward(inp, h, c, w_big, w_ch):
    """inp: (B, N, H), h: (B, H), c: (B, C), packed weights from pack_params.

    Returns (h_t, c_t)."""
    B, N, H = inp.shape
    C = c.shape[1]
    f32 = jnp.float32
    k = N * H + H + 1
    k_pad = _round_up(k, 128)

    # Augmented LHS: [inp flattened | h | 1.0 (bias column) | zero pad].  The mean over N,
    # the [x|h] concat and all gate biases are absorbed by w_big.
    xaug = jnp.concatenate(
        [inp.reshape(B, N * H).astype(f32),
         h.astype(f32),
         jnp.ones((B, 1), f32),
         jnp.zeros((B, k_pad - k), f32)], axis=1)                            # (B, k_pad)

    # c padded to a full 128-lane block.  Lane C carries 2.0: after gating with
    # f=i=0.5, g=0 on pad lanes it becomes exactly 1.0 and multiplies the b_ch row.
    c_in = jnp.concatenate(
        [c.astype(f32),
         jnp.full((B, 1), 2.0, f32),
         jnp.zeros((B, C_BLK - C - 1), f32)], axis=1)                        # (B, 128)

    vmem = pl.BlockSpec(memory_space=pltpu.MemorySpace.VMEM)
    slab = pl.pallas_call(
        _gru_cell_kernel,
        out_shape=jax.ShapeDtypeStruct((B, 2 * C_BLK), jnp.float32),
        in_specs=[vmem, vmem, vmem, vmem],
        out_specs=vmem,
    )(xaug, c_in, w_big, w_ch)

    h_t = slab[:, :H]
    c_t = slab[:, C_BLK:C_BLK + C]
    return h_t, c_t


def init_params(key, h_size, c_size):
    """Deterministic synthetic init in PyTorch nn.Linear layout: W (out, in), b (out,)."""
    shapes = {
        "i_t_x": (c_size, h_size), "i_t_h": (c_size, h_size),
        "f_t_x": (c_size, h_size), "f_t_h": (c_size, h_size),
        "g_t_x": (c_size, h_size), "g_t_h": (c_size, h_size),
        "o_t_x": (h_size, h_size), "o_t_h": (h_size, h_size),
        "c_t_h": (h_size, c_size),
    }
    params = {}
    for name, (out_f, in_f) in shapes.items():
        key, kw, kb = jax.random.split(key, 3)
        w = 0.1 * jax.random.normal(kw, (out_f, in_f), dtype=jnp.float32)
        b = 0.1 * jax.random.normal(kb, (out_f,), dtype=jnp.float32)
        params[name] = (w, b)
    return params


def gru_reference(inp, h, c, params):
    """Pure-JAX reference mirroring the PyTorch forward (unfused)."""
    x = jnp.mean(inp, axis=1)

    def lin(v, name):
        w, b = params[name]
        return v @ w.T + b

    i_t = jax.nn.sigmoid(lin(x, "i_t_x") + lin(h, "i_t_h"))
    f_t = jax.nn.sigmoid(lin(x, "f_t_x") + lin(h, "f_t_h"))
    g_t = jnp.tanh(lin(x, "g_t_x") + lin(h, "g_t_h"))
    o_t = jax.nn.sigmoid(lin(x, "o_t_x") + lin(h, "o_t_h"))
    c_t = f_t * c + i_t * g_t
    h_t = o_t * jnp.tanh(lin(c_t, "c_t_h"))
    return h_t, c_t


if __name__ == "__main__":
    B, N, H, C = 8, 16, 32, 64   # batch, num_points, h_size, c_size

    key = jax.random.PRNGKey(0)
    k_inp, k_h, k_c, k_params = jax.random.split(key, 4)
    inp = jax.random.normal(k_inp, (B, N, H), dtype=jnp.float32)
    h = jax.random.normal(k_h, (B, H), dtype=jnp.float32)
    c = jax.random.normal(k_c, (B, C), dtype=jnp.float32)
    params = init_params(k_params, H, C)

    # Packed weights are precomputed ONCE (outside the per-step path).
    w_big, w_ch = jax.block_until_ready(pack_params(params, N, H, C))

    gru_step = jax.jit(gru_forward)
    h_t, c_t = gru_step(inp, h, c, w_big, w_ch)
    jax.block_until_ready((h_t, c_t))

    h_ref, c_ref = gru_reference(inp, h, c, params)
    assert h_t.shape == (B, H) and c_t.shape == (B, C)
    assert jnp.allclose(h_t, h_ref, atol=1e-5, rtol=1e-5), float(jnp.max(jnp.abs(h_t - h_ref)))
    assert jnp.allclose(c_t, c_ref, atol=1e-5, rtol=1e-5), float(jnp.max(jnp.abs(c_t - c_ref)))

    print("KERNEL_OK")
</pallas_src>

<mosaic_0001>
module attributes {stable_mosaic.version = 11 : i64} {
  func.func @_gru_cell_kernel(%arg0: memref<8x640xf32, #tpu.memory_space<vmem>>, %arg1: memref<8x128xf32, #tpu.memory_space<vmem>>, %arg2: memref<640x512xf32, #tpu.memory_space<vmem>>, %arg3: memref<128x128xf32, #tpu.memory_space<vmem>>, %arg4: memref<8x256xf32, #tpu.memory_space<vmem>>) attributes {dimension_semantics = [], scalar_prefetch = 0 : i64, scratch_operands = 0 : i64, tpu.core_type = #tpu.core_type<tc>} {
    %c0 = arith.constant 0 : index
    %c0_0 = arith.constant 0 : index
    %0 = vector.load %arg0[%c0, %c0_0] : memref<8x640xf32, #tpu.memory_space<vmem>>, vector<8x640xf32>
    %c0_1 = arith.constant 0 : index
    %c0_2 = arith.constant 0 : index
    %1 = vector.load %arg2[%c0_1, %c0_2] : memref<640x512xf32, #tpu.memory_space<vmem>>, vector<640x512xf32>
    %cst = arith.constant dense<0.000000e+00> : vector<8x512xf32>
    %2 = tpu.matmul %0, %1, %cst {dimension_numbers = #tpu.dot_dimension_numbers<[1], [0], [0], [1], [0, 0, 1, 1], [], []>} : vector<8x640xf32>, vector<640x512xf32>, vector<8x512xf32> -> vector<8x512xf32>
    %3 = vector.extract_strided_slice %2 {offsets = [0, 0], sizes = [8, 128], strides = [1, 1]} : vector<8x512xf32> to vector<8x128xf32>
    %4 = arith.negf %3 : vector<8x128xf32>
    %5 = math.exp %4 : vector<8x128xf32>
    %cst_3 = arith.constant 1.000000e+00 : f32
    %6 = vector.broadcast %cst_3 : f32 to vector<8x128xf32>
    %7 = arith.addf %6, %5 : vector<8x128xf32>
    %8 = arith.divf %6, %7 : vector<8x128xf32>
    %9 = vector.extract_strided_slice %2 {offsets = [0, 128], sizes = [8, 128], strides = [1, 1]} : vector<8x512xf32> to vector<8x128xf32>
    %10 = arith.negf %9 : vector<8x128xf32>
    %11 = math.exp %10 : vector<8x128xf32>
    %cst_4 = arith.constant 1.000000e+00 : f32
    %12 = vector.broadcast %cst_4 : f32 to vector<8x128xf32>
    %13 = arith.addf %12, %11 : vector<8x128xf32>
    %14 = arith.divf %12, %13 : vector<8x128xf32>
    %15 = vector.extract_strided_slice %2 {offsets = [0, 256], sizes = [8, 128], strides = [1, 1]} : vector<8x512xf32> to vector<8x128xf32>
    %16 = math.tanh %15 : vector<8x128xf32>
    %17 = vector.extract_strided_slice %2 {offsets = [0, 384], sizes = [8, 128], strides = [1, 1]} : vector<8x512xf32> to vector<8x128xf32>
    %18 = arith.negf %17 : vector<8x128xf32>
    %19 = math.exp %18 : vector<8x128xf32>
    %cst_5 = arith.constant 1.000000e+00 : f32
    %20 = vector.broadcast %cst_5 : f32 to vector<8x128xf32>
    %21 = arith.addf %20, %19 : vector<8x128xf32>
    %22 = arith.divf %20, %21 : vector<8x128xf32>
    %c0_6 = arith.constant 0 : index
    %c0_7 = arith.constant 0 : index
    %23 = vector.load %arg1[%c0_6, %c0_7] : memref<8x128xf32, #tpu.memory_space<vmem>>, vector<8x128xf32>
    %24 = arith.mulf %14, %23 : vector<8x128xf32>
    %25 = arith.mulf %8, %16 : vector<8x128xf32>
    %26 = arith.addf %24, %25 : vector<8x128xf32>
    %c0_8 = arith.constant 0 : index
    %c0_9 = arith.constant 0 : index
    %27 = vector.load %arg3[%c0_8, %c0_9] : memref<128x128xf32, #tpu.memory_space<vmem>>, vector<128x128xf32>
    %cst_10 = arith.constant dense<0.000000e+00> : vector<8x128xf32>
    %28 = tpu.matmul %26, %27, %cst_10 {dimension_numbers = #tpu.dot_dimension_numbers<[1], [0], [0], [1], [0, 0, 1, 1], [], []>} : vector<8x128xf32>, vector<128x128xf32>, vector<8x128xf32> -> vector<8x128xf32>
    %29 = math.tanh %28 : vector<8x128xf32>
    %30 = arith.mulf %22, %29 : vector<8x128xf32>
    %c0_11 = arith.constant 0 : index
    %c0_12 = arith.constant 0 : index
    %31 = vector.load %arg4[%c0_11, %c0_12] : memref<8x256xf32, #tpu.memory_space<vmem>>, vector<8x128xf32>
    tpu.vector_store %arg4[%c0_11, %c0_12], %30 {strides = array<i32>} : memref<8x256xf32, #tpu.memory_space<vmem>>, vector<8x128xf32>,
    %c0_13 = arith.constant 0 : index
    %c128 = arith.constant 128 : index
    %32 = vector.load %arg4[%c0_13, %c128] : memref<8x256xf32, #tpu.memory_space<vmem>>, vector<8x128xf32>
    tpu.vector_store %arg4[%c0_13, %c128], %26 {strides = array<i32>} : memref<8x256xf32, #tpu.memory_space<vmem>>, vector<8x128xf32>,
    return
  }
}

</mosaic_0001>

<bundles_post_ra>
// kernel: gru_forward.1
= control target key start
LH: loop header
LB: loop body
LE: loop exit
PB: predicated region body
PF: predicated region fallthrough
CT: control target
= control target key end

     0   :  { %9 = vsyncpa [#allocation3], 0  ;;  %s1480_s0 = inlined_call_operand.vmem [shape: f32[8,640], index: 0, kind: input, shape index: {}]   ;;  %s1481_s1 = inlined_call_operand.vmem [shape: f32[8,128], index: 1, kind: input, shape index: {}]   ;;  %s1482_s2 = inlined_call_operand.hbm [shape: f32[640,512], index: 2, kind: input, shape index: {}]   ;;  %s1483_s3 = inlined_call_operand.hbm [shape: f32[128,128], index: 3, kind: input, shape index: {}]   ;;  %s1484_s4 = inlined_call_operand.vmem [shape: f32[8,256], index: 4, kind: output, shape index: {}]  }
   0x1   :  { %10 = vsyncpa [#allocation5], 0  ;;  %s1395_s15 = smov [#allocation2]   ;;  %s1347_s19 = scalar_lea.hbm %s1482_s2, 40960 }
   0x2   :  { %s20_s16 = sshll.u32 %s1395_s15, 4  ;;  %p1348_p0 = scmp.ne.s32.totalorder %s1482_s2, %s1347_s19  ;;  %s21_s16 = int_to_ptr.vmem [resolvable:$true] %s20_s16 }
   0x3   :  { %p1351_p1 = scmp.lt.u32.totalorder %s1347_s19, %s1482_s2 }
   0x5   :  { %p1353_p2 = pnand %p1351_p1, %p1348_p0 }
   0x7   :  { %1356 = shalt.err (!%p1353_p2)
}
   0x8   :  { %s1357_s24 = scalar_lea.vmem %s21_s16, 40960  ;;  %p1362_p4 = scmp.lt.s32.totalorder %s21_s16, %s21_s16 }
   0x9   :  { %p1358_p3 = scmp.ne.s32.totalorder %s21_s16, %s1357_s24  ;;  %p1363_p5 = scmp.lt.s32.totalorder %s1357_s24, %s1357_s24 }
   0xb   :  { %p1364_p6 = por %p1363_p5, %p1362_p4 }
   0xd   :  { %p1365_p7 = pnand %p1364_p6, %p1358_p3 }
   0xf   :  { %1368 = shalt.err (!%p1365_p7)
}
  0x10   :  { %s1396_s25 = smov 512   ;;  %s1397_s26 = smov 32  }
  0x11   :  { %26 = dma.hbm_to_vmem [thread:$0]  %s1482_s2, 40960, %s21_s16, [#allocation3], %s1396_s25, %s1396_s25, %s1397_s26  }
  0x12   :  { %s1398_s29 = smov [#allocation4]   ;;  %s1369_s7 = scalar_lea.hbm %s1483_s3, 2048 }
  0x13   :  { %s32_s30 = sshll.u32 %s1398_s29, 4  ;;  %p1370_p8 = scmp.ne.s32.totalorder %s1483_s3, %s1369_s7  ;;  %s33_s30 = int_to_ptr.vmem [resolvable:$true] %s32_s30 }
  0x14   :  { %p1373_p9 = scmp.lt.u32.totalorder %s1369_s7, %s1483_s3 }
  0x16   :  { %p1375_p10 = pnand %p1373_p9, %p1370_p8 }
  0x18   :  { %1378 = shalt.err (!%p1375_p10)
}
  0x19   :  { %s1379_s12 = scalar_lea.vmem %s33_s30, 2048  ;;  %p1384_p12 = scmp.lt.s32.totalorder %s33_s30, %s33_s30 }
  0x1a   :  { %p1380_p11 = scmp.ne.s32.totalorder %s33_s30, %s1379_s12  ;;  %p1385_p13 = scmp.lt.s32.totalorder %s1379_s12, %s1379_s12 }
  0x1c   :  { %p1386_p0 = por %p1385_p13, %p1384_p12 }
  0x1e   :  { %p1387_p1 = pnand %p1386_p0, %p1380_p11 }
  0x20   :  { %1390 = shalt.err (!%p1387_p1)
}
  0x21   :  { %s1399_s2 = smov 128   ;;  %s1400_s13 = smov 8  }
  0x22   :  { %38 = dma.hbm_to_vmem [thread:$0]  %s1483_s3, 2048, %s33_s30, [#allocation5], %s1399_s2, %s1399_s2, %s1400_s13  }
  0x23   :  { %1391 = dma.done.wait [#allocation3], 40960  }
  0x24   :  { %1392 = vsyncadd [#allocation3], 4294926336 }
  0x25   :  { %1393 = dma.done.wait [#allocation5], 2048  }
  0x26   :  { %1394 = vsyncadd [#allocation5], 4294965248  ;;  %v51_v0 = vld [vmem:[#allocation2 + $0x8] sm:$0xff]  ;;  %v53_v2 = vld [vmem:[#allocation2 + $0x18] sm:$0xff]  ;;  %vm1403_vm0 = vmmov 0  }
  0x27   :  { %v55_v1 = vld [vmem:[#allocation2 + $0x28] sm:$0xff]  ;;  %v57_v4 = vld [vmem:[#allocation2 + $0x38] sm:$0xff]  ;;  %v50_v5 = vld [vmem:[#allocation2] sm:$0xff] }
  0x28   :  { %v970_v3 = vpack.c.bf16 %v55_v1, %v51_v0  ;;  %v54_v6 = vld [vmem:[#allocation2 + $0x20] sm:$0xff]  ;;  %v1130_v7 = vpack.c.bf16 %v57_v4, %v53_v2  ;;  %v52_v9 = vld [vmem:[#allocation2 + $0x10] sm:$0xff]  ;;  %v59_v11 = vld [vmem:[#allocation2 + $0x48] sm:$0xff] }
  0x29   :  { %v972_v8 = vpack.c.bf16 %v54_v6, %v50_v5  ;;  %v56_v10 = vld [vmem:[#allocation2 + $0x30] sm:$0xff]  ;;  %v63_v13 = vld [vmem:[#allocation2 + $0x68] sm:$0xff]  ;;  %v61_v14 = vld [vmem:[#allocation2 + $0x58] sm:$0xff] }
  0x2a   :  { %971 = vmatprep.subr.bf16.mxu0 %v970_v3  ;;  %v1132_v12 = vpack.c.bf16 %v56_v10, %v52_v9  ;;  %v65_v15 = vld [vmem:[#allocation2 + $0x78] sm:$0xff]  ;;  %1131 = vmatprep.subr.bf16.mxu1 %v1130_v7  ;;  %v974_v16 = vpack.c.bf16 %v63_v13, %v59_v11  ;;  %v58_v18 = vld [vmem:[#allocation2 + $0x40] sm:$0xff]  ;;  %v60_v20 = vld [vmem:[#allocation2 + $0x50] sm:$0xff] }
  0x2b   :  { %973 = vmatpush1.bf16.msra.mxu0 %v972_v8  ;;  %v1134_v17 = vpack.c.bf16 %v65_v15, %v61_v14  ;;  %v62_v19 = vld [vmem:[#allocation2 + $0x60] sm:$0xff]  ;;  %v64_v22 = vld [vmem:[#allocation2 + $0x70] sm:$0xff]  ;;  %v67_v23 = vld [vmem:[#allocation2 + $0x88] sm:$0xff] }
  0x2c   :  { %1133 = vmatpush1.bf16.msra.mxu1 %v1132_v12  ;;  %v976_v21 = vpack.c.bf16 %v62_v19, %v58_v18  ;;  %v71_v24 = vld [vmem:[#allocation2 + $0xa8] sm:$0xff]  ;;  %975 = vmatprep.subr.bf16.mxu0 %v974_v16  ;;  %v1136_v25 = vpack.c.bf16 %v64_v22, %v60_v20  ;;  %v69_v27 = vld [vmem:[#allocation2 + $0x98] sm:$0xff]  ;;  %v66_v29 = vld [vmem:[#allocation2 + $0x80] sm:$0xff] }
  0x2d   :  { %1135 = vmatprep.subr.bf16.mxu1 %v1134_v17  ;;  %v978_v26 = vpack.c.bf16 %v71_v24, %v67_v23  ;;  %v73_v28 = vld [vmem:[#allocation2 + $0xb8] sm:$0xff]  ;;  %v70_v31 = vld [vmem:[#allocation2 + $0xa0] sm:$0xff]  ;;  %v68_v32 = vld [vmem:[#allocation2 + $0x90] sm:$0xff] }
  0x2e   :  { %v1138_v30 = vpack.c.bf16 %v73_v28, %v69_v27  ;;  %v72_v33 = vld [vmem:[#allocation2 + $0xb0] sm:$0xff]  ;;  %v980_v34 = vpack.c.bf16 %v70_v31, %v66_v29  ;;  %v75_v35 = vld [vmem:[#allocation2 + $0xc8] sm:$0xff]  ;;  %v77_v37 = vld [vmem:[#allocation2 + $0xd8] sm:$0xff] }
  0x2f   :  { %977 = vmatpush1.bf16.msra.mxu0 %v976_v21  ;;  %v79_v36 = vld [vmem:[#allocation2 + $0xe8] sm:$0xff]  ;;  %v1140_v38 = vpack.c.bf16 %v72_v33, %v68_v32  ;;  %v81_v40 = vld [vmem:[#allocation2 + $0xf8] sm:$0xff]  ;;  %v74_v41 = vld [vmem:[#allocation2 + $0xc0] sm:$0xff] }
  0x30   :  { %1137 = vmatpush1.bf16.msra.mxu1 %v1136_v25  ;;  %979 = vmatprep.subr.bf16.mxu0 %v978_v26  ;;  %v982_v39 = vpack.c.bf16 %v79_v36, %v75_v35  ;;  %v78_v42 = vld [vmem:[#allocation2 + $0xe0] sm:$0xff]  ;;  %v1142_v43 = vpack.c.bf16 %v81_v40, %v77_v37  ;;  %v76_v44 = vld [vmem:[#allocation2 + $0xd0] sm:$0xff]  ;;  %v83_v46 = vld [vmem:[#allocation2 + $0x108] sm:$0xff] }
  0x31   :  { %1139 = vmatprep.subr.bf16.mxu1 %v1138_v30  ;;  %v80_v45 = vld [vmem:[#allocation2 + $0xf0] sm:$0xff]  ;;  %v87_v47 = vld [vmem:[#allocation2 + $0x128] sm:$0xff]  ;;  %v85_v48 = vld [vmem:[#allocation2 + $0x118] sm:$0xff]  ;;  %v984_v50 = vpack.c.bf16 %v78_v42, %v74_v41 }
  0x32   :  { %v89_v49 = vld [vmem:[#allocation2 + $0x138] sm:$0xff]  ;;  %v1144_v51 = vpack.c.bf16 %v80_v45, %v76_v44  ;;  %v986_v52 = vpack.c.bf16 %v87_v47, %v83_v46  ;;  %v82_v53 = vld [vmem:[#allocation2 + $0x100] sm:$0xff]  ;;  %v84_v55 = vld [vmem:[#allocation2 + $0x110] sm:$0xff] }
  0x33   :  { %981 = vmatpush1.bf16.msra.mxu0 %v980_v34  ;;  %v86_v54 = vld [vmem:[#allocation2 + $0x120] sm:$0xff]  ;;  %v1146_v56 = vpack.c.bf16 %v89_v49, %v85_v48  ;;  %v88_v57 = vld [vmem:[#allocation2 + $0x130] sm:$0xff]  ;;  %v91_v58 = vld [vmem:[#allocation2 + $0x148] sm:$0xff] }
  0x34   :  { %1141 = vmatpush1.bf16.msra.mxu1 %v1140_v38  ;;  %983 = vmatprep.subr.bf16.mxu0 %v982_v39  ;;  %v95_v59 = vld [vmem:[#allocation2 + $0x168] sm:$0xff]  ;;  %v93_v60 = vld [vmem:[#allocation2 + $0x158] sm:$0xff]  ;;  %v988_v62 = vpack.c.bf16 %v86_v54, %v82_v53  ;;  %v1148_v63 = vpack.c.bf16 %v88_v57, %v84_v55  ;;  %v90_v1 = vld [vmem:[#allocation2 + $0x140] sm:$0xff] }
  0x35   :  { %1143 = vmatprep.subr.bf16.mxu1 %v1142_v43  ;;  %v97_v61 = vld [vmem:[#allocation2 + $0x178] sm:$0xff]  ;;  %v990_v0 = vpack.c.bf16 %v95_v59, %v91_v58  ;;  %v94_v2 = vld [vmem:[#allocation2 + $0x160] sm:$0xff]  ;;  %v92_v3 = vld [vmem:[#allocation2 + $0x150] sm:$0xff] }
  0x36   :  { %v1150_v4 = vpack.c.bf16 %v97_v61, %v93_v60  ;;  %v96_v5 = vld [vmem:[#allocation2 + $0x170] sm:$0xff]  ;;  %v99_v6 = vld [vmem:[#allocation2 + $0x188] sm:$0xff]  ;;  %v101_v8 = vld [vmem:[#allocation2 + $0x198] sm:$0xff]  ;;  %v992_v10 = vpack.c.bf16 %v94_v2, %v90_v1 }
  0x37   :  { %985 = vmatpush1.bf16.msra.mxu0 %v984_v50  ;;  %v103_v7 = vld [vmem:[#allocation2 + $0x1a8] sm:$0xff]  ;;  %v105_v9 = vld [vmem:[#allocation2 + $0x1b8] sm:$0xff]  ;;  %v1152_v11 = vpack.c.bf16 %v96_v5, %v92_v3  ;;  %v98_v13 = vld [vmem:[#allocation2 + $0x180] sm:$0xff] }
  0x38   :  { %1145 = vmatpush1.bf16.msra.mxu1 %v1144_v51  ;;  %987 = vmatprep.subr.bf16.mxu0 %v986_v52  ;;  %v994_v12 = vpack.c.bf16 %v103_v7, %v99_v6  ;;  %v102_v14 = vld [vmem:[#allocation2 + $0x1a0] sm:$0xff]  ;;  %v100_v15 = vld [vmem:[#allocation2 + $0x190] sm:$0xff]  ;;  %v1154_v16 = vpack.c.bf16 %v105_v9, %v101_v8  ;;  %v107_v18 = vld [vmem:[#allocation2 + $0x1c8] sm:$0xff] }
  0x39   :  { %1147 = vmatprep.subr.bf16.mxu1 %v1146_v56  ;;  %v104_v17 = vld [vmem:[#allocation2 + $0x1b0] sm:$0xff]  ;;  %v111_v19 = vld [vmem:[#allocation2 + $0x1e8] sm:$0xff]  ;;  %v109_v20 = vld [vmem:[#allocation2 + $0x1d8] sm:$0xff]  ;;  %v996_v22 = vpack.c.bf16 %v102_v14, %v98_v13 }
  0x3a   :  { %v113_v21 = vld [vmem:[#allocation2 + $0x1f8] sm:$0xff]  ;;  %v1156_v23 = vpack.c.bf16 %v104_v17, %v100_v15  ;;  %v998_v24 = vpack.c.bf16 %v111_v19, %v107_v18  ;;  %v106_v25 = vld [vmem:[#allocation2 + $0x1c0] sm:$0xff]  ;;  %v108_v27 = vld [vmem:[#allocation2 + $0x1d0] sm:$0xff] }
  0x3b   :  { %989 = vmatpush1.bf16.msra.mxu0 %v988_v62  ;;  %v110_v26 = vld [vmem:[#allocation2 + $0x1e0] sm:$0xff]  ;;  %v1158_v28 = vpack.c.bf16 %v113_v21, %v109_v20  ;;  %v112_v29 = vld [vmem:[#allocation2 + $0x1f0] sm:$0xff]  ;;  %v115_v30 = vld [vmem:[#allocation2 + $0x208] sm:$0xff] }
  0x3c   :  { %1149 = vmatpush1.bf16.msra.mxu1 %v1148_v63  ;;  %991 = vmatprep.subr.bf16.mxu0 %v990_v0  ;;  %v119_v31 = vld [vmem:[#allocation2 + $0x228] sm:$0xff]  ;;  %v117_v32 = vld [vmem:[#allocation2 + $0x218] sm:$0xff]  ;;  %v1000_v34 = vpack.c.bf16 %v110_v26, %v106_v25  ;;  %v1160_v35 = vpack.c.bf16 %v112_v29, %v108_v27  ;;  %v114_v37 = vld [vmem:[#allocation2 + $0x200] sm:$0xff] }
  0x3d   :  { %1151 = vmatprep.subr.bf16.mxu1 %v1150_v4  ;;  %v121_v33 = vld [vmem:[#allocation2 + $0x238] sm:$0xff]  ;;  %v1002_v36 = vpack.c.bf16 %v119_v31, %v115_v30  ;;  %v118_v38 = vld [vmem:[#allocation2 + $0x220] sm:$0xff]  ;;  %v116_v39 = vld [vmem:[#allocation2 + $0x210] sm:$0xff] }
  0x3e   :  { %v1162_v40 = vpack.c.bf16 %v121_v33, %v117_v32  ;;  %v120_v41 = vld [vmem:[#allocation2 + $0x230] sm:$0xff]  ;;  %v123_v42 = vld [vmem:[#allocation2 + $0x248] sm:$0xff]  ;;  %v125_v44 = vld [vmem:[#allocation2 + $0x258] sm:$0xff]  ;;  %v1004_v46 = vpack.c.bf16 %v118_v38, %v114_v37 }
  0x3f   :  { %993 = vmatpush1.bf16.msra.mxu0 %v992_v10  ;;  %v127_v43 = vld [vmem:[#allocation2 + $0x268] sm:$0xff]  ;;  %v129_v45 = vld [vmem:[#allocation2 + $0x278] sm:$0xff]  ;;  %v1164_v47 = vpack.c.bf16 %v120_v41, %v116_v39  ;;  %v122_v49 = vld [vmem:[#allocation2 + $0x240] sm:$0xff] }
  0x40   :  { %1153 = vmatpush1.bf16.msra.mxu1 %v1152_v11  ;;  %995 = vmatprep.subr.bf16.mxu0 %v994_v12  ;;  %v1006_v48 = vpack.c.bf16 %v127_v43, %v123_v42  ;;  %v126_v50 = vld [vmem:[#allocation2 + $0x260] sm:$0xff]  ;;  %v124_v51 = vld [vmem:[#allocation2 + $0x250] sm:$0xff]  ;;  %v1166_v52 = vpack.c.bf16 %v129_v45, %v125_v44  ;;  %v131_v54 = vld [vmem:[#allocation2 + $0x288] sm:$0xff] }
  0x41   :  { %1155 = vmatprep.subr.bf16.mxu1 %v1154_v16  ;;  %v128_v53 = vld [vmem:[#allocation2 + $0x270] sm:$0xff]  ;;  %v135_v55 = vld [vmem:[#allocation2 + $0x2a8] sm:$0xff]  ;;  %v133_v56 = vld [vmem:[#allocation2 + $0x298] sm:$0xff]  ;;  %v1008_v58 = vpack.c.bf16 %v126_v50, %v122_v49 }
  0x42   :  { %v137_v57 = vld [vmem:[#allocation2 + $0x2b8] sm:$0xff]  ;;  %v1168_v59 = vpack.c.bf16 %v128_v53, %v124_v51  ;;  %v1010_v60 = vpack.c.bf16 %v135_v55, %v131_v54  ;;  %v130_v61 = vld [vmem:[#allocation2 + $0x280] sm:$0xff]  ;;  %v132_v63 = vld [vmem:[#allocation2 + $0x290] sm:$0xff] }
  0x43   :  { %997 = vmatpush1.bf16.msra.mxu0 %v996_v22  ;;  %v134_v62 = vld [vmem:[#allocation2 + $0x2a0] sm:$0xff]  ;;  %v1170_v0 = vpack.c.bf16 %v137_v57, %v133_v56  ;;  %v136_v1 = vld [vmem:[#allocation2 + $0x2b0] sm:$0xff]  ;;  %v139_v2 = vld [vmem:[#allocation2 + $0x2c8] sm:$0xff] }
  0x44   :  { %1157 = vmatpush1.bf16.msra.mxu1 %v1156_v23  ;;  %999 = vmatprep.subr.bf16.mxu0 %v998_v24  ;;  %v143_v3 = vld [vmem:[#allocation2 + $0x2e8] sm:$0xff]  ;;  %v141_v4 = vld [vmem:[#allocation2 + $0x2d8] sm:$0xff]  ;;  %v1012_v6 = vpack.c.bf16 %v134_v62, %v130_v61  ;;  %v138_v7 = vld [vmem:[#allocation2 + $0x2c0] sm:$0xff]  ;;  %v1172_v8 = vpack.c.bf16 %v136_v1, %v132_v63 }
  0x45   :  { %1159 = vmatprep.subr.bf16.mxu1 %v1158_v28  ;;  %v145_v5 = vld [vmem:[#allocation2 + $0x2f8] sm:$0xff]  ;;  %v1014_v9 = vpack.c.bf16 %v143_v3, %v139_v2  ;;  %v142_v10 = vld [vmem:[#allocation2 + $0x2e0] sm:$0xff]  ;;  %v140_v11 = vld [vmem:[#allocation2 + $0x2d0] sm:$0xff] }
  0x46   :  { %v144_v12 = vld [vmem:[#allocation2 + $0x2f0] sm:$0xff]  ;;  %v1174_v13 = vpack.c.bf16 %v145_v5, %v141_v4  ;;  %v147_v14 = vld [vmem:[#allocation2 + $0x308] sm:$0xff]  ;;  %v149_v17 = vld [vmem:[#allocation2 + $0x318] sm:$0xff]  ;;  %v1016_v19 = vpack.c.bf16 %v142_v10, %v138_v7 }
  0x47   :  { %1001 = vmatpush1.bf16.msra.mxu0 %v1000_v34  ;;  %v151_v15 = vld [vmem:[#allocation2 + $0x328] sm:$0xff]  ;;  %v153_v18 = vld [vmem:[#allocation2 + $0x338] sm:$0xff]  ;;  %v1176_v20 = vpack.c.bf16 %v144_v12, %v140_v11  ;;  %v146_v22 = vld [vmem:[#allocation2 + $0x300] sm:$0xff] }
  0x48   :  { %1161 = vmatpush1.bf16.msra.mxu1 %v1160_v35  ;;  %1003 = vmatprep.subr.bf16.mxu0 %v1002_v36  ;;  %v46_v16 = vld [vmem:[%s1480_s0 + $0x8] sm:$0xff]  ;;  %v1018_v21 = vpack.c.bf16 %v151_v15, %v147_v14  ;;  %v150_v23 = vld [vmem:[#allocation2 + $0x320] sm:$0xff]  ;;  %v148_v24 = vld [vmem:[#allocation2 + $0x310] sm:$0xff]  ;;  %v1178_v25 = vpack.c.bf16 %v153_v18, %v149_v17 }
  0x49   :  { %1163 = vmatprep.subr.bf16.mxu1 %v1162_v40  ;;  %434 = vmatprep.mubr.f32.mxu0 %v46_v16  ;;  %v152_v26 = vld [vmem:[#allocation2 + $0x330] sm:$0xff]  ;;  %v155_v27 = vld [vmem:[#allocation2 + $0x348] sm:$0xff]  ;;  %v157_v29 = vld [vmem:[#allocation2 + $0x358] sm:$0xff]  ;;  %v1020_v31 = vpack.c.bf16 %v150_v23, %v146_v22 }
  0x4a   :  { %647 = vmatprep.mubr.f32.mxu1 %v46_v16  ;;  %v159_v28 = vld [vmem:[#allocation2 + $0x368] sm:$0xff]  ;;  %v161_v30 = vld [vmem:[#allocation2 + $0x378] sm:$0xff]  ;;  %v1180_v32 = vpack.c.bf16 %v152_v26, %v148_v24  ;;  %v154_v34 = vld [vmem:[#allocation2 + $0x340] sm:$0xff] }
  0x4b   :  { %1005 = vmatpush1.bf16.msra.mxu0 %v1004_v46  ;;  %v1022_v33 = vpack.c.bf16 %v159_v28, %v155_v27  ;;  %v158_v35 = vld [vmem:[#allocation2 + $0x360] sm:$0xff]  ;;  %v156_v36 = vld [vmem:[#allocation2 + $0x350] sm:$0xff]  ;;  %v1182_v37 = vpack.c.bf16 %v161_v30, %v157_v29  ;;  %v163_v39 = vld [vmem:[#allocation2 + $0x388] sm:$0xff] }
  0x4c   :  { %1165 = vmatpush1.bf16.msra.mxu1 %v1164_v47  ;;  %1007 = vmatprep.subr.bf16.mxu0 %v1006_v48  ;;  %v160_v38 = vld [vmem:[#allocation2 + $0x370] sm:$0xff]  ;;  %v167_v40 = vld [vmem:[#allocation2 + $0x3a8] sm:$0xff]  ;;  %v165_v41 = vld [vmem:[#allocation2 + $0x398] sm:$0xff]  ;;  %v1024_v43 = vpack.c.bf16 %v158_v35, %v154_v34 }
  0x4d   :  { %1167 = vmatprep.subr.bf16.mxu1 %v1166_v52  ;;  %v169_v42 = vld [vmem:[#allocation2 + $0x3b8] sm:$0xff]  ;;  %v1184_v44 = vpack.c.bf16 %v160_v38, %v156_v36  ;;  %v1026_v45 = vpack.c.bf16 %v167_v40, %v163_v39  ;;  %v162_v46 = vld [vmem:[#allocation2 + $0x380] sm:$0xff]  ;;  %v164_v48 = vld [vmem:[#allocation2 + $0x390] sm:$0xff] }
  0x4e   :  { %v166_v47 = vld [vmem:[#allocation2 + $0x3a0] sm:$0xff]  ;;  %v1186_v49 = vpack.c.bf16 %v169_v42, %v165_v41  ;;  %v168_v50 = vld [vmem:[#allocation2 + $0x3b0] sm:$0xff]  ;;  %v171_v51 = vld [vmem:[#allocation2 + $0x3c8] sm:$0xff] }
  0x4f   :  { %1009 = vmatpush1.bf16.msra.mxu0 %v1008_v58  ;;  %v175_v52 = vld [vmem:[#allocation2 + $0x3e8] sm:$0xff]  ;;  %v173_v53 = vld [vmem:[#allocation2 + $0x3d8] sm:$0xff]  ;;  %v1028_v55 = vpack.c.bf16 %v166_v47, %v162_v46  ;;  %v1188_v56 = vpack.c.bf16 %v168_v50, %v164_v48  ;;  %v170_v58 = vld [vmem:[#allocation2 + $0x3c0] sm:$0xff] }
  0x50   :  { %1169 = vmatpush1.bf16.msra.mxu1 %v1168_v59  ;;  %1011 = vmatprep.subr.bf16.mxu0 %v1010_v60  ;;  %v177_v54 = vld [vmem:[#allocation2 + $0x3f8] sm:$0xff]  ;;  %v1030_v57 = vpack.c.bf16 %v175_v52, %v171_v51  ;;  %v174_v59 = vld [vmem:[#allocation2 + $0x3e0] sm:$0xff]  ;;  %v172_v60 = vld [vmem:[#allocation2 + $0x3d0] sm:$0xff] }
  0x51   :  { %1171 = vmatprep.subr.bf16.mxu1 %v1170_v0  ;;  %v1190_v61 = vpack.c.bf16 %v177_v54, %v173_v53  ;;  %v176_v62 = vld [vmem:[#allocation2 + $0x3f0] sm:$0xff]  ;;  %v179_v63 = vld [vmem:[#allocation2 + $0x408] sm:$0xff]  ;;  %v181_v1 = vld [vmem:[#allocation2 + $0x418] sm:$0xff]  ;;  %v1032_v3 = vpack.c.bf16 %v174_v59, %v170_v58 }
  0x52   :  { %v183_v0 = vld [vmem:[#allocation2 + $0x428] sm:$0xff]  ;;  %v185_v2 = vld [vmem:[#allocation2 + $0x438] sm:$0xff]  ;;  %v1192_v4 = vpack.c.bf16 %v176_v62, %v172_v60  ;;  %v182_v7 = vld [vmem:[#allocation2 + $0x420] sm:$0xff] }
  0x53   :  { %1013 = vmatpush1.bf16.msra.mxu0 %v1012_v6  ;;  %v1034_v5 = vpack.c.bf16 %v183_v0, %v179_v63  ;;  %v178_v6 = vld [vmem:[#allocation2 + $0x400] sm:$0xff]  ;;  %v184_v10 = vld [vmem:[#allocation2 + $0x430] sm:$0xff]  ;;  %v187_v11 = vld [vmem:[#allocation2 + $0x448] sm:$0xff] }
  0x54   :  { %1173 = vmatpush1.bf16.msra.mxu1 %v1172_v8  ;;  %1015 = vmatprep.subr.bf16.mxu0 %v1014_v9  ;;  %v180_v8 = vld [vmem:[#allocation2 + $0x410] sm:$0xff]  ;;  %v1194_v9 = vpack.c.bf16 %v185_v2, %v181_v1  ;;  %v191_v12 = vld [vmem:[#allocation2 + $0x468] sm:$0xff]  ;;  %v193_v14 = vld [vmem:[#allocation2 + $0x478] sm:$0xff]  ;;  %v1036_v16 = vpack.c.bf16 %v182_v7, %v178_v6 }
  0x55   :  { %1175 = vmatprep.subr.bf16.mxu1 %v1174_v13  ;;  %v189_v13 = vld [vmem:[#allocation2 + $0x458] sm:$0xff]  ;;  %v45_v15 = vld [vmem:[%s1480_s0] sm:$0xff]  ;;  %v1196_v17 = vpack.c.bf16 %v184_v10, %v180_v8  ;;  %v1038_v18 = vpack.c.bf16 %v191_v12, %v187_v11  ;;  %v192_v23 = vld [vmem:[#allocation2 + $0x470] sm:$0xff] }
  0x56   :  { %v1198_v22 = vpack.c.bf16 %v193_v14, %v189_v13  ;;  %v195_v24 = vld [vmem:[#allocation2 + $0x488] sm:$0xff]  ;;  %v197_v26 = vld [vmem:[#allocation2 + $0x498] sm:$0xff]  ;;  %v200_v35 = vld [vmem:[#allocation2 + $0x4b0] sm:$0xff] }
  0x57   :  { %1017 = vmatpush1.bf16.msra.mxu0 %v1016_v19  ;;  %v186_v19 = vld [vmem:[#allocation2 + $0x440] sm:$0xff]  ;;  %v201_v27 = vld [vmem:[#allocation2 + $0x4b8] sm:$0xff]  ;;  %v203_v36 = vld [vmem:[#allocation2 + $0x4c8] sm:$0xff] }
  0x58   :  { %1177 = vmatpush1.bf16.msra.mxu1 %v1176_v20  ;;  %1019 = vmatprep.subr.bf16.mxu0 %v1018_v21  ;;  %v190_v20 = vld [vmem:[#allocation2 + $0x460] sm:$0xff]  ;;  %v188_v21 = vld [vmem:[#allocation2 + $0x450] sm:$0xff]  ;;  %v1202_v34 = vpack.c.bf16 %v201_v27, %v197_v26  ;;  %v205_v38 = vld [vmem:[#allocation2 + $0x4d8] sm:$0xff] }
  0x59   :  { %1179 = vmatprep.subr.bf16.mxu1 %v1178_v25  ;;  %v199_v25 = vld [vmem:[#allocation2 + $0x4a8] sm:$0xff]  ;;  %v1040_v28 = vpack.c.bf16 %v190_v20, %v186_v19  ;;  %v1200_v29 = vpack.c.bf16 %v192_v23, %v188_v21  ;;  %v209_v39 = vld [vmem:[#allocation2 + $0x4f8] sm:$0xff]  ;;  %v208_v47 = vld [vmem:[#allocation2 + $0x4f0] sm:$0xff] }
  0x5a   :  { %v1042_v30 = vpack.c.bf16 %v199_v25, %v195_v24  ;;  %v1206_v46 = vpack.c.bf16 %v209_v39, %v205_v38  ;;  %v211_v48 = vld [vmem:[#allocation2 + $0x508] sm:$0xff]  ;;  %v213_v50 = vld [vmem:[#allocation2 + $0x518] sm:$0xff]  ;;  %v216_v59 = vld [vmem:[#allocation2 + $0x530] sm:$0xff] }
  0x5b   :  { %1021 = vmatpush1.bf16.msra.mxu0 %v1020_v31  ;;  %v194_v31 = vld [vmem:[#allocation2 + $0x480] sm:$0xff]  ;;  %v217_v51 = vld [vmem:[#allocation2 + $0x538] sm:$0xff]  ;;  %v219_v60 = vld [vmem:[#allocation2 + $0x548] sm:$0xff] }
  0x5c   :  { %1181 = vmatpush1.bf16.msra.mxu1 %v1180_v32  ;;  %1023 = vmatprep.subr.bf16.mxu0 %v1022_v33  ;;  %v198_v32 = vld [vmem:[#allocation2 + $0x4a0] sm:$0xff]  ;;  %v196_v33 = vld [vmem:[#allocation2 + $0x490] sm:$0xff]  ;;  %v1210_v58 = vpack.c.bf16 %v217_v51, %v213_v50  ;;  %v221_v62 = vld [vmem:[#allocation2 + $0x558] sm:$0xff] }
  0x5d   :  { %1183 = vmatprep.subr.bf16.mxu1 %v1182_v37  ;;  %v207_v37 = vld [vmem:[#allocation2 + $0x4e8] sm:$0xff]  ;;  %v1044_v40 = vpack.c.bf16 %v198_v32, %v194_v31  ;;  %v1204_v41 = vpack.c.bf16 %v200_v35, %v196_v33  ;;  %v225_v63 = vld [vmem:[#allocation2 + $0x578] sm:$0xff]  ;;  %v224_v7 = vld [vmem:[#allocation2 + $0x570] sm:$0xff] }
  0x5e   :  { %v1046_v42 = vpack.c.bf16 %v207_v37, %v203_v36  ;;  %v1214_v6 = vpack.c.bf16 %v225_v63, %v221_v62  ;;  %v227_v8 = vld [vmem:[#allocation2 + $0x588] sm:$0xff]  ;;  %v229_v10 = vld [vmem:[#allocation2 + $0x598] sm:$0xff]  ;;  %v226_v13 = vld [vmem:[#allocation2 + $0x580] sm:$0xff] }
  0x5f   :  { %1025 = vmatpush1.bf16.msra.mxu0 %v1024_v43  ;;  %v202_v43 = vld [vmem:[#allocation2 + $0x4c0] sm:$0xff]  ;;  %v233_v11 = vld [vmem:[#allocation2 + $0x5b8] sm:$0xff]  ;;  %v235_v20 = vld [vmem:[#allocation2 + $0x5c8] sm:$0xff] }
  0x60   :  { %1185 = vmatpush1.bf16.msra.mxu1 %v1184_v44  ;;  %1027 = vmatprep.subr.bf16.mxu0 %v1026_v45  ;;  %v206_v44 = vld [vmem:[#allocation2 + $0x4e0] sm:$0xff]  ;;  %v204_v45 = vld [vmem:[#allocation2 + $0x4d0] sm:$0xff]  ;;  %v1218_v19 = vpack.c.bf16 %v233_v11, %v229_v10  ;;  %v239_v21 = vld [vmem:[#allocation2 + $0x5e8] sm:$0xff] }
  0x61   :  { %1187 = vmatprep.subr.bf16.mxu1 %v1186_v49  ;;  %v215_v49 = vld [vmem:[#allocation2 + $0x528] sm:$0xff]  ;;  %v1048_v52 = vpack.c.bf16 %v206_v44, %v202_v43  ;;  %v1208_v53 = vpack.c.bf16 %v208_v47, %v204_v45  ;;  %v237_v23 = vld [vmem:[#allocation2 + $0x5d8] sm:$0xff]  ;;  %v1062_v27 = vpack.c.bf16 %v239_v21, %v235_v20  ;;  %v240_v32 = vld [vmem:[#allocation2 + $0x5f0] sm:$0xff] }
  0x62   :  { %v1050_v54 = vpack.c.bf16 %v215_v49, %v211_v48  ;;  %v241_v24 = vld [vmem:[#allocation2 + $0x5f8] sm:$0xff]  ;;  %v243_v33 = vld [vmem:[#allocation2 + $0x608] sm:$0xff]  ;;  %v248_v44 = vld [vmem:[#allocation2 + $0x630] sm:$0xff] }
  0x63   :  { %1029 = vmatpush1.bf16.msra.mxu0 %v1028_v55  ;;  %v210_v55 = vld [vmem:[#allocation2 + $0x500] sm:$0xff]  ;;  %v1222_v31 = vpack.c.bf16 %v241_v24, %v237_v23  ;;  %v245_v35 = vld [vmem:[#allocation2 + $0x618] sm:$0xff]  ;;  %v251_v45 = vld [vmem:[#allocation2 + $0x648] sm:$0xff] }
  0x64   :  { %1189 = vmatpush1.bf16.msra.mxu1 %v1188_v56  ;;  %1031 = vmatprep.subr.bf16.mxu0 %v1030_v57  ;;  %v214_v56 = vld [vmem:[#allocation2 + $0x520] sm:$0xff]  ;;  %v212_v57 = vld [vmem:[#allocation2 + $0x510] sm:$0xff]  ;;  %v249_v36 = vld [vmem:[#allocation2 + $0x638] sm:$0xff] }
  0x65   :  { %1191 = vmatprep.subr.bf16.mxu1 %v1190_v61  ;;  %v223_v61 = vld [vmem:[#allocation2 + $0x568] sm:$0xff]  ;;  %v1052_v0 = vpack.c.bf16 %v214_v56, %v210_v55  ;;  %v1212_v1 = vpack.c.bf16 %v216_v59, %v212_v57  ;;  %v1226_v43 = vpack.c.bf16 %v249_v36, %v245_v35  ;;  %v253_v47 = vld [vmem:[#allocation2 + $0x658] sm:$0xff]  ;;  %v256_v56 = vld [vmem:[#allocation2 + $0x670] sm:$0xff] }
  0x66   :  { %v1054_v2 = vpack.c.bf16 %v223_v61, %v219_v60  ;;  %v257_v48 = vld [vmem:[#allocation2 + $0x678] sm:$0xff]  ;;  %v259_v57 = vld [vmem:[#allocation2 + $0x688] sm:$0xff]  ;;  %v274_v24 = vld [vmem:[#allocation2 + $0x700] sm:$0xff] }
  0x67   :  { %1033 = vmatpush1.bf16.msra.mxu0 %v1032_v3  ;;  %v218_v3 = vld [vmem:[#allocation2 + $0x540] sm:$0xff]  ;;  %v1230_v55 = vpack.c.bf16 %v257_v48, %v253_v47  ;;  %v261_v59 = vld [vmem:[#allocation2 + $0x698] sm:$0xff] }
  0x68   :  { %1193 = vmatpush1.bf16.msra.mxu1 %v1192_v4  ;;  %1035 = vmatprep.subr.bf16.mxu0 %v1034_v5  ;;  %v222_v4 = vld [vmem:[#allocation2 + $0x560] sm:$0xff]  ;;  %v220_v5 = vld [vmem:[#allocation2 + $0x550] sm:$0xff]  ;;  %v265_v60 = vld [vmem:[#allocation2 + $0x6b8] sm:$0xff] }
  0x69   :  { %1195 = vmatprep.subr.bf16.mxu1 %v1194_v9  ;;  %v231_v9 = vld [vmem:[#allocation2 + $0x5a8] sm:$0xff]  ;;  %v1056_v12 = vpack.c.bf16 %v222_v4, %v218_v3  ;;  %v1216_v14 = vpack.c.bf16 %v224_v7, %v220_v5  ;;  %v1234_v3 = vpack.c.bf16 %v265_v60, %v261_v59  ;;  %v264_v4 = vld [vmem:[#allocation2 + $0x6b0] sm:$0xff]  ;;  %v269_v7 = vld [vmem:[#allocation2 + $0x6d8] sm:$0xff] }
  0x6a   :  { %435 = vmatmul.mubr.f32.vlgmr.msra.gmra.mrb[0].mxu0 %v45_v15  ;;  %v267_v5 = vld [vmem:[#allocation2 + $0x6c8] sm:$0xff]  ;;  %v281_v20 = vld [vmem:[#allocation2 + $0x738] sm:$0xff]  ;;  %v282_v36 = vld [vmem:[#allocation2 + $0x740] sm:$0xff] }
  0x6b   :  { %1037 = vmatpush1.bf16.msra.mxu0 %v1036_v16  ;;  %648 = vmatmul.mubr.f32.vlgmr.msra.gmra.mrb[0].mxu1 %v45_v15  ;;  %v1058_v15 = vpack.c.bf16 %v231_v9, %v227_v8  ;;  %v230_v16 = vld [vmem:[#allocation2 + $0x5a0] sm:$0xff]  ;;  %v273_v8 = vld [vmem:[#allocation2 + $0x6f8] sm:$0xff] }
  0x6c   :  { %1197 = vmatpush1.bf16.msra.mxu1 %v1196_v17  ;;  %1039 = vmatprep.subr.bf16.mxu0 %v1038_v18  ;;  %v228_v17 = vld [vmem:[#allocation2 + $0x590] sm:$0xff]  ;;  %v1060_v25 = vpack.c.bf16 %v230_v16, %v226_v13  ;;  %v270_v13 = vld [vmem:[#allocation2 + $0x6e0] sm:$0xff] }
  0x6d   :  { %1199 = vmatprep.subr.bf16.mxu1 %v1198_v22  ;;  %v232_v18 = vld [vmem:[#allocation2 + $0x5b0] sm:$0xff]  ;;  %v48_v22 = vld [vmem:[%s1480_s0 + $0x18] sm:$0xff]  ;;  %v290_v48 = vld [vmem:[#allocation2 + $0x780] sm:$0xff] }
  0x6e   :  { %505 = vmatprep.mubr.f32.mxu0 %v48_v22  ;;  %718 = vmatprep.mubr.f32.mxu1 %v48_v22  ;;  %v1220_v26 = vpack.c.bf16 %v232_v18, %v228_v17  ;;  %v272_v16 = vld [vmem:[#allocation2 + $0x6f0] sm:$0xff]  ;;  %v275_v17 = vld [vmem:[#allocation2 + $0x708] sm:$0xff]  ;;  %v298_v60 = vld [vmem:[#allocation2 + $0x7c0] sm:$0xff] }
  0x6f   :  { %1041 = vmatpush1.bf16.msra.mxu0 %v1040_v28  ;;  %v234_v28 = vld [vmem:[#allocation2 + $0x5c0] sm:$0xff]  ;;  %v279_v18 = vld [vmem:[#allocation2 + $0x728] sm:$0xff] }
  0x70   :  { %1201 = vmatpush1.bf16.msra.mxu1 %v1200_v29  ;;  %1043 = vmatprep.subr.bf16.mxu0 %v1042_v30  ;;  %v238_v29 = vld [vmem:[#allocation2 + $0x5e0] sm:$0xff]  ;;  %v236_v30 = vld [vmem:[#allocation2 + $0x5d0] sm:$0xff]  ;;  %v1082_v23 = vpack.c.bf16 %v279_v18, %v275_v17 }
  0x71   :  { %1203 = vmatprep.subr.bf16.mxu1 %v1202_v34  ;;  %v247_v34 = vld [vmem:[#allocation2 + $0x628] sm:$0xff]  ;;  %v1064_v37 = vpack.c.bf16 %v238_v29, %v234_v28  ;;  %v1224_v38 = vpack.c.bf16 %v240_v32, %v236_v30  ;;  %v280_v28 = vld [vmem:[#allocation2 + $0x730] sm:$0xff]  ;;  %v289_v32 = vld [vmem:[#allocation2 + $0x778] sm:$0xff] }
  0x72   :  { %v1066_v39 = vpack.c.bf16 %v247_v34, %v243_v33  ;;  %v283_v29 = vld [vmem:[#allocation2 + $0x748] sm:$0xff]  ;;  %v47_v17 = vld [vmem:[%s1480_s0 + $0x10] sm:$0xff] }
  0x73   :  { %1045 = vmatpush1.bf16.msra.mxu0 %v1044_v40  ;;  %v242_v40 = vld [vmem:[#allocation2 + $0x600] sm:$0xff]  ;;  %v287_v30 = vld [vmem:[#allocation2 + $0x768] sm:$0xff] }
  0x74   :  { %1205 = vmatpush1.bf16.msra.mxu1 %v1204_v41  ;;  %1047 = vmatprep.subr.bf16.mxu0 %v1046_v42  ;;  %v246_v41 = vld [vmem:[#allocation2 + $0x620] sm:$0xff]  ;;  %v244_v42 = vld [vmem:[#allocation2 + $0x610] sm:$0xff]  ;;  %v1086_v35 = vpack.c.bf16 %v287_v30, %v283_v29  ;;  %v329_v29 = vld [vmem:[#allocation2 + $0x8b8] sm:$0xff] }
  0x75   :  { %1207 = vmatprep.subr.bf16.mxu1 %v1206_v46  ;;  %v255_v46 = vld [vmem:[#allocation2 + $0x668] sm:$0xff]  ;;  %v1068_v49 = vpack.c.bf16 %v246_v41, %v242_v40  ;;  %v1228_v50 = vpack.c.bf16 %v248_v44, %v244_v42  ;;  %v288_v40 = vld [vmem:[#allocation2 + $0x770] sm:$0xff]  ;;  %v297_v44 = vld [vmem:[#allocation2 + $0x7b8] sm:$0xff] }
  0x76   :  { %v1070_v51 = vpack.c.bf16 %v255_v46, %v251_v45  ;;  %v291_v41 = vld [vmem:[#allocation2 + $0x788] sm:$0xff] }
  0x77   :  { %1049 = vmatpush1.bf16.msra.mxu0 %v1048_v52  ;;  %v250_v52 = vld [vmem:[#allocation2 + $0x640] sm:$0xff]  ;;  %v295_v42 = vld [vmem:[#allocation2 + $0x7a8] sm:$0xff] }
  0x78   :  { %1209 = vmatpush1.bf16.msra.mxu1 %v1208_v53  ;;  %1051 = vmatprep.subr.bf16.mxu0 %v1050_v54  ;;  %v254_v53 = vld [vmem:[#allocation2 + $0x660] sm:$0xff]  ;;  %v252_v54 = vld [vmem:[#allocation2 + $0x650] sm:$0xff]  ;;  %v1090_v47 = vpack.c.bf16 %v295_v42, %v291_v41  ;;  %v333_v41 = vld [vmem:[#allocation2 + $0x8d8] sm:$0xff] }
  0x79   :  { %1211 = vmatprep.subr.bf16.mxu1 %v1210_v58  ;;  %v263_v58 = vld [vmem:[#allocation2 + $0x6a8] sm:$0xff]  ;;  %v1072_v61 = vpack.c.bf16 %v254_v53, %v250_v52  ;;  %v1232_v62 = vpack.c.bf16 %v256_v56, %v252_v54  ;;  %v296_v52 = vld [vmem:[#allocation2 + $0x7b0] sm:$0xff]  ;;  %v305_v56 = vld [vmem:[#allocation2 + $0x7f8] sm:$0xff] }
  0x7a   :  { %v1074_v63 = vpack.c.bf16 %v263_v58, %v259_v57  ;;  %v299_v53 = vld [vmem:[#allocation2 + $0x7c8] sm:$0xff]  ;;  %v337_v42 = vld [vmem:[#allocation2 + $0x8f8] sm:$0xff] }
  0x7b   :  { %1053 = vmatpush1.bf16.msra.mxu0 %v1052_v0  ;;  %v258_v0 = vld [vmem:[#allocation2 + $0x680] sm:$0xff]  ;;  %v303_v54 = vld [vmem:[#allocation2 + $0x7e8] sm:$0xff] }
  0x7c   :  { %1213 = vmatpush1.bf16.msra.mxu1 %v1212_v1  ;;  %1055 = vmatprep.subr.bf16.mxu0 %v1054_v2  ;;  %v262_v1 = vld [vmem:[#allocation2 + $0x6a0] sm:$0xff]  ;;  %v260_v2 = vld [vmem:[#allocation2 + $0x690] sm:$0xff]  ;;  %v1094_v59 = vpack.c.bf16 %v303_v54, %v299_v53  ;;  %v341_v53 = vld [vmem:[#allocation2 + $0x918] sm:$0xff] }
  0x7d   :  { %1215 = vmatprep.subr.bf16.mxu1 %v1214_v6  ;;  %v271_v6 = vld [vmem:[#allocation2 + $0x6e8] sm:$0xff]  ;;  %v1076_v9 = vpack.c.bf16 %v262_v1, %v258_v0  ;;  %v1236_v10 = vpack.c.bf16 %v264_v4, %v260_v2  ;;  %v304_v0 = vld [vmem:[#allocation2 + $0x7f0] sm:$0xff]  ;;  %v313_v4 = vld [vmem:[#allocation2 + $0x838] sm:$0xff] }
  0x7e   :  { %v1078_v11 = vpack.c.bf16 %v271_v6, %v267_v5  ;;  %v307_v1 = vld [vmem:[#allocation2 + $0x808] sm:$0xff]  ;;  %v345_v54 = vld [vmem:[#allocation2 + $0x938] sm:$0xff] }
  0x7f   :  { %1057 = vmatpush1.bf16.msra.mxu0 %v1056_v12  ;;  %v266_v12 = vld [vmem:[#allocation2 + $0x6c0] sm:$0xff]  ;;  %v311_v2 = vld [vmem:[#allocation2 + $0x828] sm:$0xff] }
  0x80   :  { %1217 = vmatpush1.bf16.msra.mxu1 %v1216_v14  ;;  %1059 = vmatprep.subr.bf16.mxu0 %v1058_v15  ;;  %v268_v14 = vld [vmem:[#allocation2 + $0x6d0] sm:$0xff]  ;;  %v1238_v15 = vpack.c.bf16 %v273_v8, %v269_v7  ;;  %v1080_v21 = vpack.c.bf16 %v270_v13, %v266_v12  ;;  %v1098_v7 = vpack.c.bf16 %v311_v2, %v307_v1  ;;  %v306_v8 = vld [vmem:[#allocation2 + $0x800] sm:$0xff]  ;;  %v315_v13 = vld [vmem:[#allocation2 + $0x848] sm:$0xff] }
  0x81   :  { %1219 = vmatprep.subr.bf16.mxu1 %v1218_v19  ;;  %v277_v19 = vld [vmem:[#allocation2 + $0x718] sm:$0xff]  ;;  %v1240_v22 = vpack.c.bf16 %v272_v16, %v268_v14  ;;  %v312_v12 = vld [vmem:[#allocation2 + $0x830] sm:$0xff]  ;;  %v319_v14 = vld [vmem:[#allocation2 + $0x868] sm:$0xff] }
  0x82   :  { %v321_v16 = vld [vmem:[#allocation2 + $0x878] sm:$0xff] }
  0x83   :  { %1061 = vmatpush1.bf16.msra.mxu0 %v1060_v25  ;;  %v278_v25 = vld [vmem:[#allocation2 + $0x720] sm:$0xff]  ;;  %v349_v1 = vld [vmem:[#allocation2 + $0x958] sm:$0xff] }
  0x84   :  { %1221 = vmatpush1.bf16.msra.mxu1 %v1220_v26  ;;  %1063 = vmatprep.subr.bf16.mxu0 %v1062_v27  ;;  %v276_v26 = vld [vmem:[#allocation2 + $0x710] sm:$0xff]  ;;  %v1242_v27 = vpack.c.bf16 %v281_v20, %v277_v19  ;;  %v1084_v33 = vpack.c.bf16 %v278_v25, %v274_v24  ;;  %v1102_v20 = vpack.c.bf16 %v319_v14, %v315_v13  ;;  %v353_v2 = vld [vmem:[#allocation2 + $0x978] sm:$0xff] }
  0x85   :  { %1223 = vmatprep.subr.bf16.mxu1 %v1222_v31  ;;  %v285_v31 = vld [vmem:[#allocation2 + $0x758] sm:$0xff]  ;;  %v1244_v34 = vpack.c.bf16 %v280_v28, %v276_v26  ;;  %v320_v25 = vld [vmem:[#allocation2 + $0x870] sm:$0xff]  ;;  %v323_v26 = vld [vmem:[#allocation2 + $0x888] sm:$0xff] }
  0x86   :  { %v325_v28 = vld [vmem:[#allocation2 + $0x898] sm:$0xff] }
  0x87   :  { %1065 = vmatpush1.bf16.msra.mxu0 %v1064_v37  ;;  %v286_v37 = vld [vmem:[#allocation2 + $0x760] sm:$0xff]  ;;  %v357_v13 = vld [vmem:[#allocation2 + $0x998] sm:$0xff] }
  0x88   :  { %1225 = vmatpush1.bf16.msra.mxu1 %v1224_v38  ;;  %1067 = vmatprep.subr.bf16.mxu0 %v1066_v39  ;;  %v284_v38 = vld [vmem:[#allocation2 + $0x750] sm:$0xff]  ;;  %v1246_v39 = vpack.c.bf16 %v289_v32, %v285_v31  ;;  %v1088_v45 = vpack.c.bf16 %v286_v37, %v282_v36  ;;  %v1266_v36 = vpack.c.bf16 %v329_v29, %v325_v28  ;;  %v361_v14 = vld [vmem:[#allocation2 + $0x9b8] sm:$0xff] }
  0x89   :  { %1227 = vmatprep.subr.bf16.mxu1 %v1226_v43  ;;  %v293_v43 = vld [vmem:[#allocation2 + $0x798] sm:$0xff]  ;;  %v1248_v46 = vpack.c.bf16 %v288_v40, %v284_v38  ;;  %v328_v37 = vld [vmem:[#allocation2 + $0x8b0] sm:$0xff]  ;;  %v331_v38 = vld [vmem:[#allocation2 + $0x8c8] sm:$0xff]  ;;  %v1401_v40 = vmov 0.0  }
  0x8b   :  { %1069 = vmatpush1.bf16.msra.mxu0 %v1068_v49  ;;  %v294_v49 = vld [vmem:[#allocation2 + $0x7a0] sm:$0xff] }
  0x8c   :  { %1229 = vmatpush1.bf16.msra.mxu1 %v1228_v50  ;;  %1071 = vmatprep.subr.bf16.mxu0 %v1070_v51  ;;  %v292_v50 = vld [vmem:[#allocation2 + $0x790] sm:$0xff]  ;;  %v1250_v51 = vpack.c.bf16 %v297_v44, %v293_v43  ;;  %v1092_v57 = vpack.c.bf16 %v294_v49, %v290_v48  ;;  %v1270_v49 = vpack.c.bf16 %v337_v42, %v333_v41  ;;  %v1402_v42 = vmov 0.0|0.0  }
  0x8d   :  { %1231 = vmatprep.subr.bf16.mxu1 %v1230_v55  ;;  %v301_v55 = vld [vmem:[#allocation2 + $0x7d8] sm:$0xff]  ;;  %v1252_v58 = vpack.c.bf16 %v296_v52, %v292_v50  ;;  %v332_v48 = vld [vmem:[#allocation2 + $0x8d0] sm:$0xff]  ;;  %v343_v52 = vld [vmem:[#allocation2 + $0x928] sm:$0xff] }
  0x8e   :  { %v336_v50 = vld [vmem:[#allocation2 + $0x8f0] sm:$0xff] }
  0x8f   :  { %1073 = vmatpush1.bf16.msra.mxu0 %v1072_v61  ;;  %v302_v61 = vld [vmem:[#allocation2 + $0x7e0] sm:$0xff] }
  0x90   :  { %1233 = vmatpush1.bf16.msra.mxu1 %v1232_v62  ;;  %1075 = vmatprep.subr.bf16.mxu0 %v1074_v63  ;;  %v300_v62 = vld [vmem:[#allocation2 + $0x7d0] sm:$0xff]  ;;  %v1254_v63 = vpack.c.bf16 %v305_v56, %v301_v55  ;;  %v1096_v5 = vpack.c.bf16 %v302_v61, %v298_v60  ;;  %v1272_v56 = vpack.c.bf16 %v336_v50, %v332_v48  ;;  %v826_v50 = vld [vmem:[#allocation4 + $0x38] sm:$0xff] }
  0x91   :  { %1235 = vmatprep.subr.bf16.mxu1 %v1234_v3  ;;  %v309_v3 = vld [vmem:[#allocation2 + $0x818] sm:$0xff]  ;;  %v1256_v6 = vpack.c.bf16 %v304_v0, %v300_v62  ;;  %v340_v60 = vld [vmem:[#allocation2 + $0x910] sm:$0xff]  ;;  %v1274_v61 = vpack.c.bf16 %v345_v54, %v341_v53  ;;  %v351_v0 = vld [vmem:[#allocation2 + $0x968] sm:$0xff] }
  0x92   :  { %v344_v62 = vld [vmem:[#allocation2 + $0x930] sm:$0xff]  ;;  %v828_v53 = vld [vmem:[#allocation4 + $0x48] sm:$0xff] }
  0x93   :  { %1077 = vmatpush1.bf16.msra.mxu0 %v1076_v9  ;;  %v310_v9 = vld [vmem:[#allocation2 + $0x820] sm:$0xff] }
  0x94   :  { %1237 = vmatpush1.bf16.msra.mxu1 %v1236_v10  ;;  %1079 = vmatprep.subr.bf16.mxu0 %v1078_v11  ;;  %v308_v10 = vld [vmem:[#allocation2 + $0x810] sm:$0xff]  ;;  %v1258_v11 = vpack.c.bf16 %v313_v4, %v309_v3  ;;  %v1100_v18 = vpack.c.bf16 %v310_v9, %v306_v8  ;;  %v1276_v4 = vpack.c.bf16 %v344_v62, %v340_v60  ;;  %v834_v62 = vld [vmem:[#allocation4 + $0x78] sm:$0xff] }
  0x95   :  { %1239 = vmatprep.subr.bf16.mxu1 %v1238_v15  ;;  %v317_v15 = vld [vmem:[#allocation2 + $0x858] sm:$0xff]  ;;  %v1260_v19 = vpack.c.bf16 %v312_v12, %v308_v10  ;;  %v348_v8 = vld [vmem:[#allocation2 + $0x950] sm:$0xff]  ;;  %v1278_v9 = vpack.c.bf16 %v353_v2, %v349_v1  ;;  %v359_v12 = vld [vmem:[#allocation2 + $0x9a8] sm:$0xff] }
  0x96   :  { %v1262_v24 = vpack.c.bf16 %v321_v16, %v317_v15  ;;  %v352_v10 = vld [vmem:[#allocation2 + $0x970] sm:$0xff] }
  0x97   :  { %1081 = vmatpush1.bf16.msra.mxu0 %v1080_v21  ;;  %v314_v21 = vld [vmem:[#allocation2 + $0x840] sm:$0xff]  ;;  %v1280_v16 = vpack.c.bf16 %v352_v10, %v348_v8 }
  0x98   :  { %1241 = vmatpush1.bf16.msra.mxu1 %v1240_v22  ;;  %1083 = vmatprep.subr.bf16.mxu0 %v1082_v23  ;;  %v318_v22 = vld [vmem:[#allocation2 + $0x860] sm:$0xff]  ;;  %v316_v23 = vld [vmem:[#allocation2 + $0x850] sm:$0xff] }
  0x99   :  { %1243 = vmatprep.subr.bf16.mxu1 %v1242_v27  ;;  %v327_v27 = vld [vmem:[#allocation2 + $0x8a8] sm:$0xff]  ;;  %v1104_v30 = vpack.c.bf16 %v318_v22, %v314_v21  ;;  %v1264_v31 = vpack.c.bf16 %v320_v25, %v316_v23  ;;  %v1282_v21 = vpack.c.bf16 %v361_v14, %v357_v13  ;;  %v360_v22 = vld [vmem:[#allocation2 + $0x9b0] sm:$0xff]  ;;  %v365_v25 = vld [vmem:[#allocation2 + $0x9d8] sm:$0xff] }
  0x9a   :  { %v1106_v32 = vpack.c.bf16 %v327_v27, %v323_v26  ;;  %v363_v23 = vld [vmem:[#allocation2 + $0x9c8] sm:$0xff]  ;;  %v369_v26 = vld [vmem:[#allocation2 + $0x9f8] sm:$0xff]  ;;  %v815_v10 = vld [vmem:[%s1481_s1] sm:$0xff] }
  0x9b   :  { %1085 = vmatpush1.bf16.msra.mxu0 %v1084_v33  ;;  %v322_v33 = vld [vmem:[#allocation2 + $0x880] sm:$0xff] }
  0x9c   :  { %1245 = vmatpush1.bf16.msra.mxu1 %v1244_v34  ;;  %1087 = vmatprep.subr.bf16.mxu0 %v1086_v35  ;;  %v326_v34 = vld [vmem:[#allocation2 + $0x8a0] sm:$0xff]  ;;  %v324_v35 = vld [vmem:[#allocation2 + $0x890] sm:$0xff] }
  0x9d   :  { %1247 = vmatprep.subr.bf16.mxu1 %v1246_v39  ;;  %v335_v39 = vld [vmem:[#allocation2 + $0x8e8] sm:$0xff]  ;;  %v1108_v43 = vpack.c.bf16 %v326_v34, %v322_v33  ;;  %v1268_v44 = vpack.c.bf16 %v328_v37, %v324_v35  ;;  %v364_v33 = vld [vmem:[#allocation2 + $0x9d0] sm:$0xff]  ;;  %v49_v37 = vld [vmem:[%s1480_s0 + $0x20] sm:$0xff] }
  0x9e   :  { %v368_v34 = vld [vmem:[#allocation2 + $0x9f0] sm:$0xff] }
  0x9f   :  { %1089 = vmatpush1.bf16.msra.mxu0 %v1088_v45  ;;  %v1110_v45 = vpack.c.bf16 %v335_v39, %v331_v38  ;;  %v819_v38 = vld [vmem:[#allocation4] sm:$0xff]  ;;  %v820_v39 = vld [vmem:[#allocation4 + $0x8] sm:$0xff] }
  0xa0   :  { %1249 = vmatpush1.bf16.msra.mxu1 %v1248_v46  ;;  %1091 = vmatprep.subr.bf16.mxu0 %v1090_v47  ;;  %v330_v46 = vld [vmem:[#allocation2 + $0x8c0] sm:$0xff]  ;;  %v1291_v41 = vpack.c.bf16 %v820_v39, %v819_v38 }
  0xa1   :  { %1251 = vmatprep.subr.bf16.mxu1 %v1250_v51  ;;  %v334_v47 = vld [vmem:[#allocation2 + $0x8e0] sm:$0xff]  ;;  %v339_v51 = vld [vmem:[#allocation2 + $0x908] sm:$0xff] }
  0xa2   :  { %v1112_v55 = vpack.c.bf16 %v334_v47, %v330_v46  ;;  %v823_v46 = vld [vmem:[#allocation4 + $0x20] sm:$0xff]  ;;  %v824_v47 = vld [vmem:[#allocation4 + $0x28] sm:$0xff] }
  0xa3   :  { %1093 = vmatpush1.bf16.msra.mxu0 %v1092_v57  ;;  %v1114_v57 = vpack.c.bf16 %v343_v52, %v339_v51  ;;  %v1297_v48 = vpack.c.bf16 %v824_v47, %v823_v46  ;;  %v827_v52 = vld [vmem:[#allocation4 + $0x40] sm:$0xff] }
  0xa4   :  { %1253 = vmatpush1.bf16.msra.mxu1 %v1252_v58  ;;  %1095 = vmatprep.subr.bf16.mxu0 %v1094_v59  ;;  %v338_v58 = vld [vmem:[#allocation2 + $0x900] sm:$0xff]  ;;  %v1303_v54 = vpack.c.bf16 %v828_v53, %v827_v52 }
  0xa5   :  { %1255 = vmatprep.subr.bf16.mxu1 %v1254_v63  ;;  %v342_v59 = vld [vmem:[#allocation2 + $0x920] sm:$0xff]  ;;  %v347_v63 = vld [vmem:[#allocation2 + $0x948] sm:$0xff] }
  0xa6   :  { %v1116_v3 = vpack.c.bf16 %v342_v59, %v338_v58  ;;  %v831_v58 = vld [vmem:[#allocation4 + $0x60] sm:$0xff]  ;;  %v832_v59 = vld [vmem:[#allocation4 + $0x68] sm:$0xff] }
  0xa7   :  { %1097 = vmatpush1.bf16.msra.mxu0 %v1096_v5  ;;  %v1118_v5 = vpack.c.bf16 %v351_v0, %v347_v63  ;;  %v1309_v60 = vpack.c.bf16 %v832_v59, %v831_v58 }
  0xa8   :  { %1257 = vmatpush1.bf16.msra.mxu1 %v1256_v6  ;;  %1099 = vmatprep.subr.bf16.mxu0 %v1098_v7  ;;  %v346_v6 = vld [vmem:[#allocation2 + $0x940] sm:$0xff] }
  0xa9   :  { %1259 = vmatprep.subr.bf16.mxu1 %v1258_v11  ;;  %v350_v7 = vld [vmem:[#allocation2 + $0x960] sm:$0xff]  ;;  %v355_v11 = vld [vmem:[#allocation2 + $0x988] sm:$0xff] }
  0xaa   :  { %506 = vmatmul.mubr.f32.vlgmr.msra.gmra.mrb[0].mxu0 %v47_v17  ;;  %v1120_v15 = vpack.c.bf16 %v350_v7, %v346_v6 }
  0xab   :  { %1101 = vmatpush1.bf16.msra.mxu0 %v1100_v18  ;;  %719 = vmatmul.mubr.f32.vlgmr.msra.gmra.mrb[0].mxu1 %v47_v17  ;;  %v1122_v17 = vpack.c.bf16 %v359_v12, %v355_v11  ;;  %v354_v18 = vld [vmem:[#allocation2 + $0x980] sm:$0xff] }
  0xac   :  { %1261 = vmatpush1.bf16.msra.mxu1 %v1260_v19  ;;  %1103 = vmatprep.subr.bf16.mxu0 %v1102_v20  ;;  %v358_v19 = vld [vmem:[#allocation2 + $0x9a0] sm:$0xff]  ;;  %v356_v20 = vld [vmem:[#allocation2 + $0x990] sm:$0xff] }
  0xad   :  { %1263 = vmatprep.subr.bf16.mxu1 %v1262_v24  ;;  %576 = vmatprep.mubr.f32.mxu0 %v1401_v40  ;;  %v367_v24 = vld [vmem:[#allocation2 + $0x9e8] sm:$0xff]  ;;  %v1124_v27 = vpack.c.bf16 %v358_v19, %v354_v18  ;;  %v1284_v28 = vpack.c.bf16 %v360_v22, %v356_v20 }
  0xae   :  { %789 = vmatprep.mubr.f32.mxu1 %v1401_v40  ;;  %v1126_v29 = vpack.c.bf16 %v367_v24, %v363_v23 }
  0xaf   :  { %1105 = vmatpush1.bf16.msra.mxu0 %v1104_v30  ;;  %v362_v30 = vld [vmem:[#allocation2 + $0x9c0] sm:$0xff] }
  0xb0   :  { %1265 = vmatpush1.bf16.msra.mxu1 %v1264_v31  ;;  %1107 = vmatprep.subr.bf16.mxu0 %v1106_v32  ;;  %v366_v31 = vld [vmem:[#allocation2 + $0x9e0] sm:$0xff]  ;;  %v1286_v32 = vpack.c.bf16 %v369_v26, %v365_v25 }
  0xb1   :  { %1267 = vmatprep.subr.bf16.mxu1 %v1266_v36  ;;  %v1128_v35 = vpack.c.bf16 %v366_v31, %v362_v30  ;;  %v1288_v36 = vpack.c.bf16 %v368_v34, %v364_v33 }
  0xb3   :  { %1109 = vmatpush1.bf16.msra.mxu0 %v1108_v43  ;;  %v821_v43 = vld [vmem:[#allocation4 + $0x10] sm:$0xff] }
  0xb4   :  { %1269 = vmatpush1.bf16.msra.mxu1 %v1268_v44  ;;  %1111 = vmatprep.subr.bf16.mxu0 %v1110_v45  ;;  %v822_v44 = vld [vmem:[#allocation4 + $0x18] sm:$0xff] }
  0xb5   :  { %1271 = vmatprep.subr.bf16.mxu1 %v1270_v49  ;;  %v1294_v45 = vpack.c.bf16 %v822_v44, %v821_v43  ;;  %v825_v49 = vld [vmem:[#allocation4 + $0x30] sm:$0xff] }
  0xb6   :  { %v1300_v51 = vpack.c.bf16 %v826_v50, %v825_v49 }
  0xb7   :  { %1113 = vmatpush1.bf16.msra.mxu0 %v1112_v55  ;;  %v829_v55 = vld [vmem:[#allocation4 + $0x50] sm:$0xff] }
  0xb8   :  { %1273 = vmatpush1.bf16.msra.mxu1 %v1272_v56  ;;  %1115 = vmatprep.subr.bf16.mxu0 %v1114_v57  ;;  %v830_v56 = vld [vmem:[#allocation4 + $0x58] sm:$0xff] }
  0xb9   :  { %1275 = vmatprep.subr.bf16.mxu1 %v1274_v61  ;;  %v1306_v57 = vpack.c.bf16 %v830_v56, %v829_v55  ;;  %v833_v61 = vld [vmem:[#allocation4 + $0x70] sm:$0xff] }
  0xba   :  { %v1312_v63 = vpack.c.bf16 %v834_v62, %v833_v61 }
  0xbb   :  { %1117 = vmatpush1.bf16.msra.mxu0 %v1116_v3 }
  0xbc   :  { %1277 = vmatpush1.bf16.msra.mxu1 %v1276_v4  ;;  %1119 = vmatprep.subr.bf16.mxu0 %v1118_v5 }
  0xbd   :  { %1279 = vmatprep.subr.bf16.mxu1 %v1278_v9 }
  0xbf   :  { %1121 = vmatpush1.bf16.msra.mxu0 %v1120_v15 }
  0xc0   :  { %1281 = vmatpush1.bf16.msra.mxu1 %v1280_v16  ;;  %1123 = vmatprep.subr.bf16.mxu0 %v1122_v17 }
  0xc1   :  { %1283 = vmatprep.subr.bf16.mxu1 %v1282_v21 }
  0xc3   :  { %1125 = vmatpush1.bf16.msra.mxu0 %v1124_v27 }
  0xc4   :  { %1285 = vmatpush1.bf16.msra.mxu1 %v1284_v28  ;;  %1127 = vmatprep.subr.bf16.mxu0 %v1126_v29 }
  0xc5   :  { %1287 = vmatprep.subr.bf16.mxu1 %v1286_v32 }
  0xc7   :  { %1129 = vmatpush1.bf16.msra.mxu0 %v1128_v35 }
  0xc8   :  { %1289 = vmatpush1.bf16.msra.mxu1 %v1288_v36  ;;  %1290 = vmatprep.subr.bf16.mxu0 %v1402_v42 }
  0xca   :  { %577 = vmatmul.mubr.f32.vlgmr.msra.gmra.mrb[0].mxu0 %v49_v37 }
  0xcb   :  { %790 = vmatmul.mubr.f32.vlgmr.msra.gmra.mrb[0].mxu1 %v49_v37  ;;  %1292 = vmatpush3.bf16.msra.mxu0 %v1291_v41 }
  0xcc   :  { %1293 = vmatprep.subr.bf16.mxu0 %v1402_v42  ;;  %967 = vmatprep.mubr.msk.f32.mxu0 %vm1403_vm0, %v1401_v40 }
  0xcf   :  { %1295 = vmatpush3.bf16.msra.mxu0 %v1294_v45 }
  0xd0   :  { %1296 = vmatprep.subr.bf16.mxu0 %v1402_v42 }
  0xd3   :  { %1298 = vmatpush3.bf16.msra.mxu0 %v1297_v48 }
  0xd4   :  { %1299 = vmatprep.subr.bf16.mxu0 %v1402_v42 }
  0xd7   :  { %1301 = vmatpush3.bf16.msra.mxu0 %v1300_v51 }
  0xd8   :  { %1302 = vmatprep.subr.bf16.mxu0 %v1402_v42 }
  0xdb   :  { %1304 = vmatpush3.bf16.msra.mxu0 %v1303_v54 }
  0xdc   :  { %1305 = vmatprep.subr.bf16.mxu0 %v1402_v42 }
  0xdf   :  { %1307 = vmatpush3.bf16.msra.mxu0 %v1306_v57 }
  0xe0   :  { %1308 = vmatprep.subr.bf16.mxu0 %v1402_v42 }
  0xe3   :  { %1310 = vmatpush3.bf16.msra.mxu0 %v1309_v60 }
  0xe4   :  { %1311 = vmatprep.subr.bf16.mxu0 %v1402_v42 }
  0xe7   :  { %1313 = vmatpush3.bf16.msra.mxu0 %v1312_v63 }
 0x19d   :  { %v578_v0 = vpop.f32.mrb[0].mxu0 }
 0x19e   :  { %v915_v1 = vmul.f32 -1.442695, %v578_v0  ;;  %v791_v2 = vpop.f32.mrb[0].mxu1  ;;  %v580_v3 = vpop.f32.mrb[1].mxu0 }
 0x19f   :  { %v916_v4 = vmul.f32 -1.442695, %v580_v3  ;;  %v793_v5 = vpop.f32.mrb[1].mxu1 }
 0x1a0   :  { %1331 = vpow2.f32 %v915_v1  ;;  %v917_v16 = vmul.f32 -1.442695, %v793_v5 }
 0x1a1   :  { %1333 = vpow2.f32 %v916_v4 }
 0x1a2   :  { %1335 = vtanh.f32 %v791_v2 }
 0x1aa   :  { %v1332_v6 = vpop.eup %1331 }
 0x1ab   :  { %v1334_v7 = vpop.eup %1333  ;;  %v799_v40 = vadd.f32 1.0, %v1332_v6 }
 0x1ac   :  { %v805_v8 = vadd.f32 1.0, %v1334_v7  ;;  %v1336_v9 = vpop.eup %1335 }
 0x1ad   :  { %1337 = vrcp.f32 %v799_v40 }
 0x1ae   :  { %1339 = vrcp.f32 %v805_v8 }
 0x1af   :  { %1341 = vpow2.f32 %v917_v16 }
 0x1b7   :  { %v1338_v11 = vpop.eup %1337 }
 0x1b8   :  { %v1340_v12 = vpop.eup %1339  ;;  %v817_v13 = vmul.f32 %v1338_v11, %v1336_v9 }
 0x1b9   :  { %v816_v14 = vmul.f32 %v1340_v12, %v815_v10  ;;  %v1342_v17 = vpop.eup %1341 }
 0x1ba   :  { %v812_v18 = vadd.f32 1.0, %v1342_v17 }
 0x1bb   :  { %v818_v15 = vadd.f32 %v817_v13, %v816_v14 }
 0x1bc   :  { %1343 = vrcp.f32 %v812_v18 }
 0x1bd   :  { %968 = vmatmul.mubr.f32.vlgmr.msra.gmra.mrb[2].mxu0 %v818_v15  ;;  %908 = vst [vmem:[%s1484_s4 + $0x8] sm:$0xff] %v818_v15 }
 0x1c6   :  { %v1344_v21 = vpop.eup %1343 }
 0x290   :  { %v901_v19 = vpop.f32.mrb[2].mxu0 }
 0x291   :  { %1345 = vtanh.f32 %v901_v19  ;;  %v969_v20 = vpop.f32.mrb[3].mxu0 }
 0x29b   :  { %v1346_v22 = vpop.eup %1345 }
 0x29c   :  { %v906_v23 = vmul.f32 %v1346_v22, %v1344_v21 }
 0x29e   :  { %907 = vst [vmem:[%s1484_s4] sm:$0xff] %v906_v23 }
 0x29f   :  { %913 = vsyncpa [#allocation3], 1 }
 0x2a0   :  { %914 = vsyncpa [#allocation5], 1 }

</bundles_post_ra>
